<compile_context>
chip_gen: v7x
topology: tpu7x:2x2x1
jax: 0.10.0
libtpu: 0.0.40
codegen_flags: <defaults>
</compile_context>

<pallas_src>
import jax
import jax.numpy as jnp
from jax.experimental import pallas as pl
from jax.experimental.pallas import tpu as pltpu

IN_FEAT = 6
HID = 64
MAX_TB = 128  # rows per grid step (cap keeps double-buffered output < ~4 MiB)


def _round_up(n, m):
    return ((n + m - 1) // m) * m


def mpe_kernel(x_ref, w1_ref, b1_ref, m_ref, b2_ref, out_ref):
    # x_ref  : (TB, 6)        input rows for this grid step
    # w1_ref : (6, 64)        fc1 weight (stored in-features x out-features)
    # b1_ref : (1, 64)        fc1 bias
    # m_ref  : (64, 4096)     expansion matrix, M[i, i*64+j] = w2[j]
    # b2_ref : (1, 4096)      fc2 bias tiled 64x
    # out_ref: (TB, 4096)     lane-dense flattened (64, 64) output per row
    y1 = jnp.dot(x_ref[...], w1_ref[...],
                 preferred_element_type=jnp.float32) + b1_ref[...]      # (TB, 64)
    out = jnp.dot(y1, m_ref[...],
                  preferred_element_type=jnp.float32) + b2_ref[...]     # (TB, 4096)
    out_ref[...] = jnp.maximum(out, 0.0).astype(out_ref.dtype)


def mpe_forward(x, w1, b1, w2, b2):
    """x: (B, 1, 6) float32. Returns (B, 64, 64) float32."""
    B = x.shape[0]
    x2 = x.reshape(B, IN_FEAT).astype(jnp.float32)      # squeeze seq=1

    # Tile size: multiple of 8 (sublane), capped at MAX_TB; pad batch to fit.
    TB = min(MAX_TB, _round_up(B, 8))
    B_pad = _round_up(B, TB)
    if B_pad != B:
        x2 = jnp.pad(x2, ((0, B_pad - B), (0, 0)))

    w1_t = jnp.transpose(w1).astype(jnp.float32)        # (6, 64)
    b1_r = b1.reshape(1, HID).astype(jnp.float32)       # (1, 64)
    w2_flat = w2.reshape(HID).astype(jnp.float32)       # (64,)
    b2_flat = b2.reshape(HID).astype(jnp.float32)       # (64,)

    # Expansion matrix: out_flat[b, i*64+j] = y1[b, i] * w2[j]
    M = (jnp.eye(HID, dtype=jnp.float32)[:, :, None]
         * w2_flat[None, None, :]).reshape(HID, HID * HID)      # (64, 4096)
    b2_tile = jnp.tile(b2_flat, HID).reshape(1, HID * HID)      # (1, 4096)

    grid = (B_pad // TB,)
    cost = pl.CostEstimate(
        flops=2 * B_pad * (IN_FEAT * HID + HID * HID * HID),
        transcendentals=0,
        bytes_accessed=4 * (B_pad * IN_FEAT + B_pad * HID * HID
                            + IN_FEAT * HID + HID + HID * HID * 2),
    )

    out_flat = pl.pallas_call(
        mpe_kernel,
        out_shape=jax.ShapeDtypeStruct((B_pad, HID * HID), jnp.float32),
        grid=grid,
        in_specs=[
            pl.BlockSpec((TB, IN_FEAT), lambda i: (i, 0)),       # x rows, pipelined
            pl.BlockSpec((IN_FEAT, HID), lambda i: (0, 0)),      # w1 resident
            pl.BlockSpec((1, HID), lambda i: (0, 0)),            # b1 resident
            pl.BlockSpec((HID, HID * HID), lambda i: (0, 0)),    # M resident (1 MiB)
            pl.BlockSpec((1, HID * HID), lambda i: (0, 0)),      # b2 tiled, resident
        ],
        out_specs=pl.BlockSpec((TB, HID * HID), lambda i: (i, 0)),
        compiler_params=pltpu.CompilerParams(
            dimension_semantics=("parallel",)),
        cost_estimate=cost,
    )(x2, w1_t, b1_r, M, b2_tile)

    # Contiguous, layout-preserving reshape back to the PyTorch output layout.
    return out_flat[:B].reshape(B, HID, HID)


def mpe_reference(x, w1, b1, w2, b2):
    """Plain-JAX reference matching the PyTorch forward."""
    y = jnp.einsum("bsf,of->bso", x, w1) + b1          # fc1: (B, 1, 64)
    y = jnp.transpose(y, (0, 2, 1))                    # (B, 64, 1)
    y = jnp.einsum("bsk,ok->bso", y, w2) + b2          # fc2: (B, 64, 64)
    return jnp.maximum(y, 0.0)


def init_params(key):
    # Deterministic init mimicking nn.Linear (uniform +/- 1/sqrt(fan_in)).
    k1, k2, k3, k4 = jax.random.split(key, 4)
    lim1 = 1.0 / jnp.sqrt(jnp.float32(IN_FEAT))
    lim2 = 1.0 / jnp.sqrt(jnp.float32(1))
    w1 = jax.random.uniform(k1, (HID, IN_FEAT), jnp.float32, -lim1, lim1)
    b1 = jax.random.uniform(k2, (HID,), jnp.float32, -lim1, lim1)
    w2 = jax.random.uniform(k3, (HID, 1), jnp.float32, -lim2, lim2)
    b2 = jax.random.uniform(k4, (HID,), jnp.float32, -lim2, lim2)
    return w1, b1, w2, b2


if __name__ == "__main__":
    key = jax.random.PRNGKey(0)
    kx, kp, kx2 = jax.random.split(key, 3)

    w1, b1, w2, b2 = init_params(kp)

    # Small batch (module-consistent shape).
    B = 2
    x = jax.random.normal(kx, (B, 1, IN_FEAT), jnp.float32)
    out = jax.block_until_ready(mpe_forward(x, w1, b1, w2, b2))
    ref = mpe_reference(x, w1, b1, w2, b2)
    assert out.shape == (B, HID, HID), out.shape
    assert jnp.allclose(out, ref, atol=1e-5, rtol=1e-5), "mismatch vs reference (B=2)"

    # Larger batch exercising multiple grid steps + tail padding.
    B2 = 260
    x_big = jax.random.normal(kx2, (B2, 1, IN_FEAT), jnp.float32)
    out_big = jax.block_until_ready(mpe_forward(x_big, w1, b1, w2, b2))
    ref_big = mpe_reference(x_big, w1, b1, w2, b2)
    assert out_big.shape == (B2, HID, HID), out_big.shape
    assert jnp.allclose(out_big, ref_big, atol=1e-5, rtol=1e-5), \
        "mismatch vs reference (B=260)"

    print("KERNEL_OK")
</pallas_src>

<mosaic_0001>
module attributes {stable_mosaic.version = 11 : i64} {
  func.func @mpe_kernel(%arg0: i32, %arg1: memref<8x6xf32, #tpu.memory_space<vmem>>, %arg2: memref<6x64xf32, #tpu.memory_space<vmem>>, %arg3: memref<1x64xf32, #tpu.memory_space<vmem>>, %arg4: memref<64x4096xf32, #tpu.memory_space<vmem>>, %arg5: memref<1x4096xf32, #tpu.memory_space<vmem>>, %arg6: memref<8x4096xf32, #tpu.memory_space<vmem>>) attributes {dimension_semantics = [#tpu.dimension_semantics<parallel>], iteration_bounds = array<i64: 1>, scalar_prefetch = 0 : i64, scratch_operands = 0 : i64, tpu.core_type = #tpu.core_type<tc>, window_params = [{transform_indices = @transform_0, window_bounds = array<i64: 8, 6>}, {pipeline_mode = #tpu.pipeline_mode<synchronous>, transform_indices = @transform_1, window_bounds = array<i64: 6, 64>}, {pipeline_mode = #tpu.pipeline_mode<synchronous>, transform_indices = @transform_2, window_bounds = array<i64: 1, 64>}, {pipeline_mode = #tpu.pipeline_mode<synchronous>, transform_indices = @transform_3, window_bounds = array<i64: 64, 4096>}, {pipeline_mode = #tpu.pipeline_mode<synchronous>, transform_indices = @transform_4, window_bounds = array<i64: 1, 4096>}, {transform_indices = @transform_5, window_bounds = array<i64: 8, 4096>}]} {
    %c0 = arith.constant 0 : index
    %c0_0 = arith.constant 0 : index
    %0 = vector.load %arg1[%c0, %c0_0] : memref<8x6xf32, #tpu.memory_space<vmem>>, vector<8x6xf32>
    %c0_1 = arith.constant 0 : index
    %c0_2 = arith.constant 0 : index
    %1 = vector.load %arg2[%c0_1, %c0_2] : memref<6x64xf32, #tpu.memory_space<vmem>>, vector<6x64xf32>
    %cst = arith.constant dense<0.000000e+00> : vector<8x64xf32>
    %2 = tpu.matmul %0, %1, %cst {dimension_numbers = #tpu.dot_dimension_numbers<[1], [0], [0], [1], [0, 0, 1, 1], [], []>} : vector<8x6xf32>, vector<6x64xf32>, vector<8x64xf32> -> vector<8x64xf32>
    %c0_3 = arith.constant 0 : index
    %c0_4 = arith.constant 0 : index
    %3 = vector.load %arg3[%c0_3, %c0_4] : memref<1x64xf32, #tpu.memory_space<vmem>>, vector<1x64xf32>
    %4 = vector.broadcast %3 : vector<1x64xf32> to vector<8x64xf32>
    %5 = arith.addf %2, %4 : vector<8x64xf32>
    %c0_5 = arith.constant 0 : index
    %c0_6 = arith.constant 0 : index
    %6 = vector.load %arg4[%c0_5, %c0_6] : memref<64x4096xf32, #tpu.memory_space<vmem>>, vector<64x4096xf32>
    %cst_7 = arith.constant dense<0.000000e+00> : vector<8x4096xf32>
    %7 = tpu.matmul %5, %6, %cst_7 {dimension_numbers = #tpu.dot_dimension_numbers<[1], [0], [0], [1], [0, 0, 1, 1], [], []>} : vector<8x64xf32>, vector<64x4096xf32>, vector<8x4096xf32> -> vector<8x4096xf32>
    %c0_8 = arith.constant 0 : index
    %c0_9 = arith.constant 0 : index
    %8 = vector.load %arg5[%c0_8, %c0_9] : memref<1x4096xf32, #tpu.memory_space<vmem>>, vector<1x4096xf32>
    %9 = vector.broadcast %8 : vector<1x4096xf32> to vector<8x4096xf32>
    %10 = arith.addf %7, %9 : vector<8x4096xf32>
    %cst_10 = arith.constant 0.000000e+00 : f32
    %11 = vector.broadcast %cst_10 : f32 to vector<8x4096xf32>
    %12 = arith.maximumf %10, %11 : vector<8x4096xf32>
    %c0_11 = arith.constant 0 : index
    %c0_12 = arith.constant 0 : index
    %13 = vector.load %arg6[%c0_11, %c0_12] : memref<8x4096xf32, #tpu.memory_space<vmem>>, vector<8x4096xf32>
    tpu.vector_store %arg6[%c0_11, %c0_12], %12 {strides = array<i32>} : memref<8x4096xf32, #tpu.memory_space<vmem>>, vector<8x4096xf32>,
    return
  }
  func.func @transform_0(%arg0: i32) -> (i32, i32) {
    %c0_i32 = arith.constant 0 : i32
    %c0_i32_0 = arith.constant 0 : i32
    return %arg0, %c0_i32 : i32, i32
  }
  func.func @transform_1(%arg0: i32) -> (i32, i32) {
    %c0_i32 = arith.constant 0 : i32
    %c0_i32_0 = arith.constant 0 : i32
    %c0_i32_1 = arith.constant 0 : i32
    return %c0_i32, %c0_i32_0 : i32, i32
  }
  func.func @transform_2(%arg0: i32) -> (i32, i32) {
    %c0_i32 = arith.constant 0 : i32
    %c0_i32_0 = arith.constant 0 : i32
    %c0_i32_1 = arith.constant 0 : i32
    return %c0_i32, %c0_i32_0 : i32, i32
  }
  func.func @transform_3(%arg0: i32) -> (i32, i32) {
    %c0_i32 = arith.constant 0 : i32
    %c0_i32_0 = arith.constant 0 : i32
    %c0_i32_1 = arith.constant 0 : i32
    return %c0_i32, %c0_i32_0 : i32, i32
  }
  func.func @transform_4(%arg0: i32) -> (i32, i32) {
    %c0_i32 = arith.constant 0 : i32
    %c0_i32_0 = arith.constant 0 : i32
    %c0_i32_1 = arith.constant 0 : i32
    return %c0_i32, %c0_i32_0 : i32, i32
  }
  func.func @transform_5(%arg0: i32) -> (i32, i32) {
    %c0_i32 = arith.constant 0 : i32
    %c0_i32_0 = arith.constant 0 : i32
    return %arg0, %c0_i32 : i32, i32
  }
}

</mosaic_0001>

<bundles_post_ra>
// kernel: tpu_custom_call.1
= control target key start
LH: loop header
LB: loop body
LE: loop exit
PB: predicated region body
PF: predicated region fallthrough
CT: control target
= control target key end

     0   :  { %10 = vsyncpa [#allocation3], 0  ;;  %s2413_s0 = inlined_call_operand.hbm [shape: f32[8,6], index: 0, kind: input, shape index: {}]   ;;  %s2414_s1 = inlined_call_operand.hbm [shape: f32[6,64], index: 1, kind: input, shape index: {}]   ;;  %s2415_s2 = inlined_call_operand.vmem [shape: f32[1,64], index: 2, kind: input, shape index: {}]   ;;  %s2416_s3 = inlined_call_operand.hbm [shape: f32[64,4096], index: 3, kind: input, shape index: {}]   ;;  %s2417_s4 = inlined_call_operand.hbm [shape: f32[1,4096], index: 4, kind: input, shape index: {}]   ;;  %s2418_s5 = inlined_call_operand.hbm [shape: f32[8,4096], index: 5, kind: output, shape index: {}]  }
   0x1   :  { %11 = vsyncpa [#allocation6], 0 }
   0x2   :  { %12 = vsyncpa [#allocation9], 0 }
   0x3   :  { %13 = vsyncpa [#allocation4], 0  ;;  %s2211_s18 = smov [#allocation5]   ;;  %s2212_s20 = smov [#allocation2]  }
   0x4   :  { %s30_s19 = sshll.u32 %s2211_s18, 4  ;;  %s20_s21 = sshll.u32 %s2212_s20, 4  ;;  %s31_s19 = int_to_ptr.vmem [resolvable:$true] %s30_s19  ;;  %s21_s21 = int_to_ptr.vmem [resolvable:$true] %s20_s21 }
   0x5   :  { %s2093_s24 = scalar_lea.hbm %s2414_s1, 128 }
   0x6   :  { %p2094_p0 = scmp.ne.s32.totalorder %s2414_s1, %s2093_s24  ;;  %p2097_p1 = scmp.lt.u32.totalorder %s2093_s24, %s2414_s1 }
   0x8   :  { %p2099_p2 = pnand %p2097_p1, %p2094_p0 }
   0xa   :  { %2102 = shalt.err (!%p2099_p2)
}
   0xb   :  { %s2103_s29 = scalar_lea.vmem %s31_s19, 128  ;;  %p2108_p4 = scmp.lt.s32.totalorder %s31_s19, %s31_s19 }
   0xc   :  { %p2104_p3 = scmp.ne.s32.totalorder %s31_s19, %s2103_s29  ;;  %p2109_p5 = scmp.lt.s32.totalorder %s2103_s29, %s2103_s29 }
   0xe   :  { %p2110_p6 = por %p2109_p5, %p2108_p4 }
  0x10   :  { %p2111_p7 = pnand %p2110_p6, %p2104_p3 }
  0x12   :  { %2114 = shalt.err (!%p2111_p7)
}
  0x13   :  { %33 = dma.hbm_to_vmem [thread:$0]  %s2414_s1, 128, %s31_s19, [#allocation6]  }
  0x14   :  { %s2115_s9 = scalar_lea.hbm %s2413_s0, 128 }
  0x15   :  { %p2116_p8 = scmp.ne.s32.totalorder %s2413_s0, %s2115_s9  ;;  %p2119_p9 = scmp.lt.u32.totalorder %s2115_s9, %s2413_s0 }
  0x17   :  { %p2121_p10 = pnand %p2119_p9, %p2116_p8 }
  0x19   :  { %2124 = shalt.err (!%p2121_p10)
}
  0x1a   :  { %s2125_s14 = scalar_lea.vmem %s21_s21, 128  ;;  %p2130_p12 = scmp.lt.s32.totalorder %s21_s21, %s21_s21 }
  0x1b   :  { %p2126_p11 = scmp.ne.s32.totalorder %s21_s21, %s2125_s14  ;;  %p2131_p13 = scmp.lt.s32.totalorder %s2125_s14, %s2125_s14 }
  0x1d   :  { %p2132_p0 = por %p2131_p13, %p2130_p12 }
  0x1f   :  { %p2133_p1 = pnand %p2132_p0, %p2126_p11 }
  0x21   :  { %2136 = shalt.err (!%p2133_p1)
}
  0x22   :  { %23 = dma.hbm_to_vmem [thread:$0]  %s2413_s0, 128, %s21_s21, [#allocation3]  }
  0x23   :  { %s2213_s16 = smov [#allocation7]   ;;  %s2137_s20 = scalar_lea.hbm %s2416_s3, 32768 }
  0x24   :  { %s41_s17 = sshll.u32 %s2213_s16, 4  ;;  %p2138_p2 = scmp.ne.s32.totalorder %s2416_s3, %s2137_s20  ;;  %s42_s17 = int_to_ptr.vmem [resolvable:$true] %s41_s17 }
  0x25   :  { %p2141_p3 = scmp.lt.u32.totalorder %s2137_s20, %s2416_s3 }
  0x27   :  { %p2143_p4 = pnand %p2141_p3, %p2138_p2 }
  0x29   :  { %2146 = shalt.err (!%p2143_p4)
}
  0x2a   :  { %s2147_s26 = scalar_lea.vmem %s42_s17, 32768  ;;  %p2152_p6 = scmp.lt.s32.totalorder %s42_s17, %s42_s17 }
  0x2b   :  { %p2148_p5 = scmp.ne.s32.totalorder %s42_s17, %s2147_s26  ;;  %p2153_p7 = scmp.lt.s32.totalorder %s2147_s26, %s2147_s26 }
  0x2d   :  { %p2154_p8 = por %p2153_p7, %p2152_p6 }
  0x2f   :  { %p2155_p9 = pnand %p2154_p8, %p2148_p5 }
  0x31   :  { %2158 = shalt.err (!%p2155_p9)
}
  0x32   :  { %s2214_s0 = smov 4096   ;;  %s2215_s21 = smov 256  }
  0x33   :  { %47 = dma.hbm_to_vmem [thread:$0]  %s2416_s3, 32768, %s42_s17, [#allocation6], %s2214_s0, %s2214_s0, %s2215_s21  }
  0x34   :  { %s2216_s29 = smov [#allocation8]   ;;  %s2159_s8 = scalar_lea.hbm %s2417_s4, 512 }
  0x35   :  { %s54_s30 = sshll.u32 %s2216_s29, 4  ;;  %p2160_p10 = scmp.ne.s32.totalorder %s2417_s4, %s2159_s8  ;;  %s55_s30 = int_to_ptr.vmem [resolvable:$true] %s54_s30 }
  0x36   :  { %p2163_p11 = scmp.lt.u32.totalorder %s2159_s8, %s2417_s4 }
  0x38   :  { %p2165_p12 = pnand %p2163_p11, %p2160_p10 }
  0x3a   :  { %2168 = shalt.err (!%p2165_p12)
}
  0x3b   :  { %s2169_s13 = scalar_lea.vmem %s55_s30, 512  ;;  %p2174_p0 = scmp.lt.s32.totalorder %s55_s30, %s55_s30 }
  0x3c   :  { %p2170_p13 = scmp.ne.s32.totalorder %s55_s30, %s2169_s13  ;;  %p2175_p1 = scmp.lt.s32.totalorder %s2169_s13, %s2169_s13 }
  0x3e   :  { %p2176_p2 = por %p2175_p1, %p2174_p0 }
  0x40   :  { %p2177_p3 = pnand %p2176_p2, %p2170_p13 }
  0x42   :  { %2180 = shalt.err (!%p2177_p3)
}
  0x43   :  { %57 = dma.hbm_to_vmem [thread:$0]  %s2417_s4, 512, %s55_s30, [#allocation9]  }
  0x44   :  { %2203 = dma.done.wait [#allocation3], 128  }
  0x45   :  { %2204 = vsyncadd [#allocation3], 4294967168 }
  0x46   :  { %2205 = dma.done.wait [#allocation6], 32896  }
  0x47   :  { %2206 = vsyncadd [#allocation6], 4294934400 }
  0x48   :  { %2207 = dma.done.wait [#allocation9], 512  }
  0x49   :  { %2208 = vsyncadd [#allocation9], 4294966784  ;;  %v2217_v0 = vmov 0.0   ;;  %vm2218_vm0 = vmmov 0   ;;  %vm83_vm1 = vcmask 1045504   ;;  %vm79_vm2 = vcmask 48128  }
  0x4a   :  { %1823 = vmatprep.subr.mxu0 %v2217_v0  ;;  %1825 = vmatprep.mubr.msk.f32.mxu0 %vm2218_vm0, %v2217_v0  ;;  %v71_v1 = vld [vmem:[#allocation5] sm:$0x3f]  ;;  %v70_v2 = vld [vmem:[#allocation2] sm:$0xff]  ;;  %v158_v3 = vld [vmem:[#allocation7 + $0x8] sm:$0xff]  ;;  %vm581_vm3 = vcmask 523264  }
  0x4b   :  { %649 = vmatprep.mubr.f32.mxu1 %v2217_v0  ;;  %1824 = vmatpush3.msk.msra.mxu0 %vm83_vm1, %v71_v1  ;;  %v190_v4 = vld [vmem:[#allocation7 + $0x108] sm:$0xff]  ;;  %v160_v5 = vld [vmem:[#allocation7 + $0x18] sm:$0xff]  ;;  %v157_v9 = vld [vmem:[#allocation7] sm:$0xff] }
  0x4c   :  { %v192_v6 = vld [vmem:[#allocation7 + $0x118] sm:$0xff]  ;;  %1826 = vmatmul.mubr.msk.f32.vlgmr.msra.gmra.mrb[0].mxu0 %vm79_vm2, %v70_v2  ;;  %v1828_v7 = vpack.c.bf16 %v190_v4, %v158_v3  ;;  %v189_v10 = vld [vmem:[#allocation7 + $0x100] sm:$0xff]  ;;  %v159_v11 = vld [vmem:[#allocation7 + $0x10] sm:$0xff] }
  0x4d   :  { %v1844_v8 = vpack.c.bf16 %v192_v6, %v160_v5  ;;  %v1830_v12 = vpack.c.bf16 %v189_v10, %v157_v9  ;;  %v191_v13 = vld [vmem:[#allocation7 + $0x110] sm:$0xff]  ;;  %v222_v14 = vld [vmem:[#allocation7 + $0x208] sm:$0xff]  ;;  %720 = vmatprep.mubr.f32.mxu0 %v2217_v0  ;;  %v224_v18 = vld [vmem:[#allocation7 + $0x218] sm:$0xff] }
  0x4e   :  { %v254_v15 = vld [vmem:[#allocation7 + $0x308] sm:$0xff]  ;;  %1829 = vmatprep.subr.bf16.mxu1 %v1828_v7  ;;  %v1846_v16 = vpack.c.bf16 %v191_v13, %v159_v11  ;;  %v256_v19 = vld [vmem:[#allocation7 + $0x318] sm:$0xff]  ;;  %v221_v20 = vld [vmem:[#allocation7 + $0x200] sm:$0xff] }
  0x4f   :  { %1845 = vmatprep.subr.bf16.mxu0 %v1844_v8  ;;  %v1832_v17 = vpack.c.bf16 %v254_v15, %v222_v14  ;;  %1831 = vmatpush1.bf16.msra.mxu1 %v1830_v12  ;;  %v1848_v21 = vpack.c.bf16 %v256_v19, %v224_v18  ;;  %v253_v22 = vld [vmem:[#allocation7 + $0x300] sm:$0xff]  ;;  %v223_v23 = vld [vmem:[#allocation7 + $0x210] sm:$0xff]  ;;  %v286_v27 = vld [vmem:[#allocation7 + $0x408] sm:$0xff] }
  0x50   :  { %v255_v24 = vld [vmem:[#allocation7 + $0x310] sm:$0xff]  ;;  %1847 = vmatpush1.bf16.msra.mxu0 %v1846_v16  ;;  %v1834_v25 = vpack.c.bf16 %v253_v22, %v221_v20  ;;  %v318_v28 = vld [vmem:[#allocation7 + $0x508] sm:$0xff]  ;;  %v288_v29 = vld [vmem:[#allocation7 + $0x418] sm:$0xff] }
  0x51   :  { %1833 = vmatprep.subr.bf16.mxu1 %v1832_v17  ;;  %v1850_v26 = vpack.c.bf16 %v255_v24, %v223_v23  ;;  %1849 = vmatprep.subr.bf16.mxu0 %v1848_v21  ;;  %v1836_v30 = vpack.c.bf16 %v318_v28, %v286_v27  ;;  %v320_v31 = vld [vmem:[#allocation7 + $0x518] sm:$0xff]  ;;  %v285_v32 = vld [vmem:[#allocation7 + $0x400] sm:$0xff]  ;;  %v287_v35 = vld [vmem:[#allocation7 + $0x410] sm:$0xff] }
  0x52   :  { %v317_v33 = vld [vmem:[#allocation7 + $0x500] sm:$0xff]  ;;  %v1852_v34 = vpack.c.bf16 %v320_v31, %v288_v29  ;;  %v319_v36 = vld [vmem:[#allocation7 + $0x510] sm:$0xff]  ;;  %v350_v37 = vld [vmem:[#allocation7 + $0x608] sm:$0xff] }
  0x53   :  { %1835 = vmatpush1.bf16.msra.mxu1 %v1834_v25  ;;  %v1838_v38 = vpack.c.bf16 %v317_v33, %v285_v32  ;;  %v382_v39 = vld [vmem:[#allocation7 + $0x708] sm:$0xff]  ;;  %v352_v40 = vld [vmem:[#allocation7 + $0x618] sm:$0xff]  ;;  %v1854_v42 = vpack.c.bf16 %v319_v36, %v287_v35  ;;  %v349_v44 = vld [vmem:[#allocation7 + $0x600] sm:$0xff] }
  0x54   :  { %v384_v41 = vld [vmem:[#allocation7 + $0x718] sm:$0xff]  ;;  %1851 = vmatpush1.bf16.msra.mxu0 %v1850_v26  ;;  %1837 = vmatprep.subr.bf16.mxu1 %v1836_v30  ;;  %v1840_v43 = vpack.c.bf16 %v382_v39, %v350_v37  ;;  %v381_v45 = vld [vmem:[#allocation7 + $0x700] sm:$0xff]  ;;  %v351_v47 = vld [vmem:[#allocation7 + $0x610] sm:$0xff] }
  0x55   :  { %1853 = vmatprep.subr.bf16.mxu0 %v1852_v34  ;;  %v1856_v46 = vpack.c.bf16 %v384_v41, %v352_v40  ;;  %v383_v48 = vld [vmem:[#allocation7 + $0x710] sm:$0xff]  ;;  %v1842_v49 = vpack.c.bf16 %v381_v45, %v349_v44  ;;  %v162_v51 = vld [vmem:[#allocation7 + $0x28] sm:$0xff]  ;;  %v164_v53 = vld [vmem:[#allocation7 + $0x38] sm:$0xff] }
  0x56   :  { %v1858_v50 = vpack.c.bf16 %v383_v48, %v351_v47  ;;  %v194_v52 = vld [vmem:[#allocation7 + $0x128] sm:$0xff]  ;;  %v196_v55 = vld [vmem:[#allocation7 + $0x138] sm:$0xff]  ;;  %v1802_v57 = vld [vmem:[%s2415_s2] ss:$0 sm:$0xff]  ;;  %s2219_s2 = smov [#allocation10]  }
  0x57   :  { %1839 = vmatpush1.bf16.msra.mxu1 %v1838_v38  ;;  %v1860_v54 = vpack.c.bf16 %v194_v52, %v162_v51  ;;  %v1876_v56 = vpack.c.bf16 %v196_v55, %v164_v53  ;;  %v161_v58 = vld [vmem:[#allocation7 + $0x20] sm:$0xff]  ;;  %v163_v60 = vld [vmem:[#allocation7 + $0x30] sm:$0xff]  ;;  %v226_v62 = vld [vmem:[#allocation7 + $0x228] sm:$0xff]  ;;  %s1791_s15 = sshll.u32 %s2219_s2, 4  ;;  %s1792_s15 = int_to_ptr.vmem [resolvable:$true] %s1791_s15 }
  0x58   :  { %1855 = vmatpush1.bf16.msra.mxu0 %v1854_v42  ;;  %1841 = vmatprep.subr.bf16.mxu1 %v1840_v43  ;;  %v193_v59 = vld [vmem:[#allocation7 + $0x120] sm:$0xff]  ;;  %v195_v61 = vld [vmem:[#allocation7 + $0x130] sm:$0xff]  ;;  %v258_v63 = vld [vmem:[#allocation7 + $0x328] sm:$0xff]  ;;  %s2181_s16 = scalar_lea.vmem %s1792_s15, 4096  ;;  %p2186_p5 = scmp.lt.s32.totalorder %s1792_s15, %s1792_s15 }
  0x59   :  { %1857 = vmatprep.subr.bf16.mxu0 %v1856_v46  ;;  %v228_v1 = vld [vmem:[#allocation7 + $0x238] sm:$0xff]  ;;  %v1862_v4 = vpack.c.bf16 %v193_v59, %v161_v58  ;;  %v1878_v5 = vpack.c.bf16 %v195_v61, %v163_v60  ;;  %v225_v6 = vld [vmem:[#allocation7 + $0x220] sm:$0xff]  ;;  %v1864_v10 = vpack.c.bf16 %v258_v63, %v226_v62  ;;  %v227_v12 = vld [vmem:[#allocation7 + $0x230] sm:$0xff]  ;;  %p2182_p4 = scmp.ne.s32.totalorder %s1792_s15, %s2181_s16  ;;  %p2187_p6 = scmp.lt.s32.totalorder %s2181_s16, %s2181_s16 }
  0x5a   :  { %v260_v2 = vld [vmem:[#allocation7 + $0x338] sm:$0xff]  ;;  %v257_v7 = vld [vmem:[#allocation7 + $0x320] sm:$0xff]  ;;  %v259_v13 = vld [vmem:[#allocation7 + $0x330] sm:$0xff] }
  0x5b   :  { %1843 = vmatpush1.bf16.msra.mxu1 %v1842_v49  ;;  %v1880_v11 = vpack.c.bf16 %v260_v2, %v228_v1  ;;  %v290_v14 = vld [vmem:[#allocation7 + $0x428] sm:$0xff]  ;;  %v292_v16 = vld [vmem:[#allocation7 + $0x438] sm:$0xff]  ;;  %v1866_v18 = vpack.c.bf16 %v257_v7, %v225_v6  ;;  %v1882_v19 = vpack.c.bf16 %v259_v13, %v227_v12  ;;  %v289_v20 = vld [vmem:[#allocation7 + $0x420] sm:$0xff]  ;;  %p2188_p7 = por %p2187_p6, %p2186_p5 }
  0x5c   :  { %1859 = vmatpush1.bf16.msra.mxu0 %v1858_v50  ;;  %1861 = vmatprep.subr.bf16.mxu1 %v1860_v54  ;;  %v322_v15 = vld [vmem:[#allocation7 + $0x528] sm:$0xff]  ;;  %v324_v17 = vld [vmem:[#allocation7 + $0x538] sm:$0xff]  ;;  %v321_v21 = vld [vmem:[#allocation7 + $0x520] sm:$0xff] }
  0x5d   :  { %1877 = vmatprep.subr.bf16.mxu0 %v1876_v56  ;;  %v1868_v22 = vpack.c.bf16 %v322_v15, %v290_v14  ;;  %v1884_v23 = vpack.c.bf16 %v324_v17, %v292_v16  ;;  %v291_v24 = vld [vmem:[#allocation7 + $0x430] sm:$0xff]  ;;  %v354_v26 = vld [vmem:[#allocation7 + $0x628] sm:$0xff]  ;;  %v356_v28 = vld [vmem:[#allocation7 + $0x638] sm:$0xff]  ;;  %v1870_v30 = vpack.c.bf16 %v321_v21, %v289_v20  ;;  %p2189_p8 = pnand %p2188_p7, %p2182_p4 }
  0x5e   :  { %v323_v25 = vld [vmem:[#allocation7 + $0x530] sm:$0xff]  ;;  %v386_v27 = vld [vmem:[#allocation7 + $0x728] sm:$0xff]  ;;  %v388_v29 = vld [vmem:[#allocation7 + $0x738] sm:$0xff] }
  0x5f   :  { %v1886_v31 = vpack.c.bf16 %v323_v25, %v291_v24  ;;  %v353_v32 = vld [vmem:[#allocation7 + $0x620] sm:$0xff]  ;;  %v1872_v34 = vpack.c.bf16 %v386_v27, %v354_v26  ;;  %v1888_v35 = vpack.c.bf16 %v388_v29, %v356_v28  ;;  %v355_v36 = vld [vmem:[#allocation7 + $0x630] sm:$0xff]  ;;  %v166_v38 = vld [vmem:[#allocation7 + $0x48] sm:$0xff] }
  0x60   :  { %v385_v33 = vld [vmem:[#allocation7 + $0x720] sm:$0xff]  ;;  %v387_v37 = vld [vmem:[#allocation7 + $0x730] sm:$0xff]  ;;  %v198_v39 = vld [vmem:[#allocation7 + $0x148] sm:$0xff] }
  0x61   :  { %v168_v40 = vld [vmem:[#allocation7 + $0x58] sm:$0xff]  ;;  %v1874_v42 = vpack.c.bf16 %v385_v33, %v353_v32  ;;  %v1890_v43 = vpack.c.bf16 %v387_v37, %v355_v36  ;;  %v165_v44 = vld [vmem:[#allocation7 + $0x40] sm:$0xff]  ;;  %v1892_v46 = vpack.c.bf16 %v198_v39, %v166_v38  ;;  %v167_v48 = vld [vmem:[#allocation7 + $0x50] sm:$0xff] }
  0x62   :  { %v200_v41 = vld [vmem:[#allocation7 + $0x158] sm:$0xff]  ;;  %v197_v45 = vld [vmem:[#allocation7 + $0x140] sm:$0xff]  ;;  %v199_v49 = vld [vmem:[#allocation7 + $0x150] sm:$0xff] }
  0x63   :  { %v1908_v47 = vpack.c.bf16 %v200_v41, %v168_v40  ;;  %v230_v50 = vld [vmem:[#allocation7 + $0x248] sm:$0xff]  ;;  %v232_v52 = vld [vmem:[#allocation7 + $0x258] sm:$0xff]  ;;  %v1894_v54 = vpack.c.bf16 %v197_v45, %v165_v44  ;;  %v1910_v55 = vpack.c.bf16 %v199_v49, %v167_v48  ;;  %v229_v56 = vld [vmem:[#allocation7 + $0x240] sm:$0xff] }
  0x64   :  { %v262_v51 = vld [vmem:[#allocation7 + $0x348] sm:$0xff]  ;;  %v264_v53 = vld [vmem:[#allocation7 + $0x358] sm:$0xff]  ;;  %v231_v60 = vld [vmem:[#allocation7 + $0x250] sm:$0xff] }
  0x65   :  { %v1896_v58 = vpack.c.bf16 %v262_v51, %v230_v50  ;;  %v1912_v59 = vpack.c.bf16 %v264_v53, %v232_v52  ;;  %v263_v61 = vld [vmem:[#allocation7 + $0x350] sm:$0xff]  ;;  %v294_v62 = vld [vmem:[#allocation7 + $0x448] sm:$0xff]  ;;  %v296_v1 = vld [vmem:[#allocation7 + $0x458] sm:$0xff] }
  0x66   :  { %v326_v63 = vld [vmem:[#allocation7 + $0x548] sm:$0xff]  ;;  %v328_v2 = vld [vmem:[#allocation7 + $0x558] sm:$0xff]  ;;  %v325_v6 = vld [vmem:[#allocation7 + $0x540] sm:$0xff] }
  0x67   :  { %v1900_v7 = vpack.c.bf16 %v326_v63, %v294_v62  ;;  %v358_v12 = vld [vmem:[#allocation7 + $0x648] sm:$0xff]  ;;  %v360_v14 = vld [vmem:[#allocation7 + $0x658] sm:$0xff] }
  0x68   :  { %v390_v13 = vld [vmem:[#allocation7 + $0x748] sm:$0xff]  ;;  %v392_v15 = vld [vmem:[#allocation7 + $0x758] sm:$0xff] }
  0x69   :  { %v1904_v20 = vpack.c.bf16 %v390_v13, %v358_v12  ;;  %v1920_v21 = vpack.c.bf16 %v392_v15, %v360_v14  ;;  %v170_v24 = vld [vmem:[#allocation7 + $0x68] sm:$0xff]  ;;  %v172_v26 = vld [vmem:[#allocation7 + $0x78] sm:$0xff] }
  0x6a   :  { %v202_v25 = vld [vmem:[#allocation7 + $0x168] sm:$0xff]  ;;  %v204_v27 = vld [vmem:[#allocation7 + $0x178] sm:$0xff] }
  0x6b   :  { %v1924_v32 = vpack.c.bf16 %v202_v25, %v170_v24  ;;  %v1940_v33 = vpack.c.bf16 %v204_v27, %v172_v26  ;;  %v234_v36 = vld [vmem:[#allocation7 + $0x268] sm:$0xff]  ;;  %v236_v38 = vld [vmem:[#allocation7 + $0x278] sm:$0xff] }
  0x6c   :  { %v266_v37 = vld [vmem:[#allocation7 + $0x368] sm:$0xff]  ;;  %v268_v39 = vld [vmem:[#allocation7 + $0x378] sm:$0xff] }
  0x6d   :  { %v1928_v44 = vpack.c.bf16 %v266_v37, %v234_v36  ;;  %v1944_v45 = vpack.c.bf16 %v268_v39, %v236_v38  ;;  %v298_v48 = vld [vmem:[#allocation7 + $0x468] sm:$0xff]  ;;  %v300_v50 = vld [vmem:[#allocation7 + $0x478] sm:$0xff] }
  0x6e   :  { %v330_v49 = vld [vmem:[#allocation7 + $0x568] sm:$0xff]  ;;  %v332_v51 = vld [vmem:[#allocation7 + $0x578] sm:$0xff] }
  0x6f   :  { %v364_v62 = vld [vmem:[#allocation7 + $0x678] sm:$0xff] }
  0x70   :  { %v396_v63 = vld [vmem:[#allocation7 + $0x778] sm:$0xff] }
  0x71   :  { %v176_v12 = vld [vmem:[#allocation7 + $0x98] sm:$0xff] }
  0x72   :  { %v208_v13 = vld [vmem:[#allocation7 + $0x198] sm:$0xff] }
  0x73   :  { %v240_v24 = vld [vmem:[#allocation7 + $0x298] sm:$0xff] }
  0x74   :  { %v272_v25 = vld [vmem:[#allocation7 + $0x398] sm:$0xff] }
  0x75   :  { %v304_v36 = vld [vmem:[#allocation7 + $0x498] sm:$0xff] }
  0x76   :  { %v336_v37 = vld [vmem:[#allocation7 + $0x598] sm:$0xff] }
 0x11f   :  { %v153_v3 = vpop.f32.mrb[0].mxu0 }
 0x120   :  { %v2305_v8 = vadd.f32 %v1802_v57, %v153_v3  ;;  %v1827_v9 = vpop.f32.mrb[1].mxu0  ;;  %v261_v57 = vld [vmem:[#allocation7 + $0x340] sm:$0xff] }
 0x121   :  { %v1898_v3 = vpack.c.bf16 %v261_v57, %v229_v56  ;;  %v1916_v9 = vpack.c.bf16 %v328_v2, %v296_v1  ;;  %v1932_v56 = vpack.c.bf16 %v330_v49, %v298_v48  ;;  %v1948_v57 = vpack.c.bf16 %v332_v51, %v300_v50  ;;  %v368_v48 = vld [vmem:[#allocation7 + $0x698] sm:$0xff] }
 0x122   :  { %1805 = vmatmul.mubr.msk.f32.vlgmr.msra.gmra.mrb[0].mxu1 %vm581_vm3, %v2305_v8  ;;  %1806 = vmatmul.mubr.msk.f32.vlgmr.msra.gmra.mrb[2].mxu0 %vm581_vm3, %v2305_v8  ;;  %v400_v49 = vld [vmem:[#allocation7 + $0x798] sm:$0xff] }
 0x123   :  { %1863 = vmatpush1.bf16.msra.mxu1 %v1862_v4  ;;  %1879 = vmatpush1.bf16.msra.mxu0 %v1878_v5  ;;  %v1914_v4 = vpack.c.bf16 %v263_v61, %v231_v60  ;;  %v293_v5 = vld [vmem:[#allocation7 + $0x440] sm:$0xff]  ;;  %v362_v60 = vld [vmem:[#allocation7 + $0x668] sm:$0xff] }
 0x124   :  { %1865 = vmatprep.subr.bf16.mxu1 %v1864_v10  ;;  %1881 = vmatprep.subr.bf16.mxu0 %v1880_v11  ;;  %v295_v10 = vld [vmem:[#allocation7 + $0x450] sm:$0xff]  ;;  %v1902_v16 = vpack.c.bf16 %v325_v6, %v293_v5  ;;  %v394_v61 = vld [vmem:[#allocation7 + $0x768] sm:$0xff]  ;;  %v1952_v6 = vpack.c.bf16 %v396_v63, %v364_v62 }
 0x125   :  { %791 = vmatprep.mubr.f32.mxu1 %v2217_v0  ;;  %862 = vmatprep.mubr.f32.mxu0 %v2217_v0  ;;  %v327_v11 = vld [vmem:[#allocation7 + $0x550] sm:$0xff]  ;;  %v1936_v5 = vpack.c.bf16 %v394_v61, %v362_v60  ;;  %v180_v60 = vld [vmem:[#allocation7 + $0xb8] sm:$0xff] }
 0x126   :  { %v1918_v17 = vpack.c.bf16 %v327_v11, %v295_v10  ;;  %v174_v10 = vld [vmem:[#allocation7 + $0x88] sm:$0xff]  ;;  %v212_v61 = vld [vmem:[#allocation7 + $0x1b8] sm:$0xff] }
 0x127   :  { %1867 = vmatpush1.bf16.msra.mxu1 %v1866_v18  ;;  %1883 = vmatpush1.bf16.msra.mxu0 %v1882_v19  ;;  %v357_v18 = vld [vmem:[#allocation7 + $0x640] sm:$0xff]  ;;  %v206_v11 = vld [vmem:[#allocation7 + $0x188] sm:$0xff] }
 0x128   :  { %1869 = vmatprep.subr.bf16.mxu1 %v1868_v22  ;;  %1885 = vmatprep.subr.bf16.mxu0 %v1884_v23  ;;  %v389_v19 = vld [vmem:[#allocation7 + $0x740] sm:$0xff]  ;;  %v359_v22 = vld [vmem:[#allocation7 + $0x650] sm:$0xff] }
 0x129   :  { %v391_v23 = vld [vmem:[#allocation7 + $0x750] sm:$0xff]  ;;  %v1906_v28 = vpack.c.bf16 %v389_v19, %v357_v18  ;;  %v1956_v18 = vpack.c.bf16 %v206_v11, %v174_v10  ;;  %v1972_v19 = vpack.c.bf16 %v208_v13, %v176_v12  ;;  %v244_v10 = vld [vmem:[#allocation7 + $0x2b8] sm:$0xff] }
 0x12a   :  { %v1922_v29 = vpack.c.bf16 %v391_v23, %v359_v22  ;;  %v238_v22 = vld [vmem:[#allocation7 + $0x288] sm:$0xff]  ;;  %v276_v11 = vld [vmem:[#allocation7 + $0x3b8] sm:$0xff] }
 0x12b   :  { %1871 = vmatpush1.bf16.msra.mxu1 %v1870_v30  ;;  %1887 = vmatpush1.bf16.msra.mxu0 %v1886_v31  ;;  %v169_v30 = vld [vmem:[#allocation7 + $0x60] sm:$0xff]  ;;  %v270_v23 = vld [vmem:[#allocation7 + $0x388] sm:$0xff] }
 0x12c   :  { %1873 = vmatprep.subr.bf16.mxu1 %v1872_v34  ;;  %1889 = vmatprep.subr.bf16.mxu0 %v1888_v35  ;;  %v201_v31 = vld [vmem:[#allocation7 + $0x160] sm:$0xff]  ;;  %v171_v34 = vld [vmem:[#allocation7 + $0x70] sm:$0xff] }
 0x12d   :  { %v203_v35 = vld [vmem:[#allocation7 + $0x170] sm:$0xff]  ;;  %v1926_v40 = vpack.c.bf16 %v201_v31, %v169_v30  ;;  %v1960_v30 = vpack.c.bf16 %v270_v23, %v238_v22  ;;  %v1976_v31 = vpack.c.bf16 %v272_v25, %v240_v24  ;;  %v308_v22 = vld [vmem:[#allocation7 + $0x4b8] sm:$0xff] }
 0x12e   :  { %v1942_v41 = vpack.c.bf16 %v203_v35, %v171_v34  ;;  %v302_v34 = vld [vmem:[#allocation7 + $0x488] sm:$0xff]  ;;  %v340_v23 = vld [vmem:[#allocation7 + $0x5b8] sm:$0xff] }
 0x12f   :  { %1875 = vmatpush1.bf16.msra.mxu1 %v1874_v42  ;;  %1891 = vmatpush1.bf16.msra.mxu0 %v1890_v43  ;;  %v233_v42 = vld [vmem:[#allocation7 + $0x260] sm:$0xff]  ;;  %v334_v35 = vld [vmem:[#allocation7 + $0x588] sm:$0xff] }
 0x130   :  { %1893 = vmatprep.subr.bf16.mxu1 %v1892_v46  ;;  %1909 = vmatprep.subr.bf16.mxu0 %v1908_v47  ;;  %v265_v43 = vld [vmem:[#allocation7 + $0x360] sm:$0xff]  ;;  %v235_v46 = vld [vmem:[#allocation7 + $0x270] sm:$0xff] }
 0x131   :  { %v267_v47 = vld [vmem:[#allocation7 + $0x370] sm:$0xff]  ;;  %v1930_v52 = vpack.c.bf16 %v265_v43, %v233_v42  ;;  %v1964_v42 = vpack.c.bf16 %v334_v35, %v302_v34  ;;  %v1980_v43 = vpack.c.bf16 %v336_v37, %v304_v36  ;;  %v372_v34 = vld [vmem:[#allocation7 + $0x6b8] sm:$0xff] }
 0x132   :  { %1807 = vmatmul.mubr.msk.f32.vlgmr.msra.gmra.mrb[2].mxu1 %vm581_vm3, %v2305_v8  ;;  %1808 = vmatmul.mubr.msk.f32.vlgmr.msra.gmra.mrb[4].mxu0 %vm581_vm3, %v2305_v8  ;;  %v1946_v53 = vpack.c.bf16 %v267_v47, %v235_v46  ;;  %v366_v46 = vld [vmem:[#allocation7 + $0x688] sm:$0xff]  ;;  %v404_v35 = vld [vmem:[#allocation7 + $0x7b8] sm:$0xff] }
 0x133   :  { %1895 = vmatpush1.bf16.msra.mxu1 %v1894_v54  ;;  %1911 = vmatpush1.bf16.msra.mxu0 %v1910_v55  ;;  %v297_v54 = vld [vmem:[#allocation7 + $0x460] sm:$0xff]  ;;  %v398_v47 = vld [vmem:[#allocation7 + $0x788] sm:$0xff] }
 0x134   :  { %1897 = vmatprep.subr.bf16.mxu1 %v1896_v58  ;;  %1913 = vmatprep.subr.bf16.mxu0 %v1912_v59  ;;  %v329_v55 = vld [vmem:[#allocation7 + $0x560] sm:$0xff]  ;;  %v299_v58 = vld [vmem:[#allocation7 + $0x470] sm:$0xff] }
 0x135   :  { %933 = vmatprep.mubr.f32.mxu1 %v2217_v0  ;;  %1004 = vmatprep.mubr.f32.mxu0 %v2217_v0  ;;  %v331_v59 = vld [vmem:[#allocation7 + $0x570] sm:$0xff]  ;;  %v1934_v1 = vpack.c.bf16 %v329_v55, %v297_v54  ;;  %v1968_v54 = vpack.c.bf16 %v398_v47, %v366_v46  ;;  %v1984_v55 = vpack.c.bf16 %v400_v49, %v368_v48  ;;  %v184_v46 = vld [vmem:[#allocation7 + $0xd8] sm:$0xff] }
 0x136   :  { %v1950_v2 = vpack.c.bf16 %v331_v59, %v299_v58  ;;  %v178_v58 = vld [vmem:[#allocation7 + $0xa8] sm:$0xff]  ;;  %v216_v47 = vld [vmem:[#allocation7 + $0x1d8] sm:$0xff] }
 0x137   :  { %1899 = vmatpush1.bf16.msra.mxu1 %v1898_v3  ;;  %1915 = vmatpush1.bf16.msra.mxu0 %v1914_v4  ;;  %v361_v3 = vld [vmem:[#allocation7 + $0x660] sm:$0xff]  ;;  %v210_v59 = vld [vmem:[#allocation7 + $0x1a8] sm:$0xff] }
 0x138   :  { %1901 = vmatprep.subr.bf16.mxu1 %v1900_v7  ;;  %1917 = vmatprep.subr.bf16.mxu0 %v1916_v9  ;;  %v393_v4 = vld [vmem:[#allocation7 + $0x760] sm:$0xff]  ;;  %v363_v7 = vld [vmem:[#allocation7 + $0x670] sm:$0xff] }
 0x139   :  { %v395_v9 = vld [vmem:[#allocation7 + $0x770] sm:$0xff]  ;;  %v1938_v14 = vpack.c.bf16 %v393_v4, %v361_v3  ;;  %v1988_v3 = vpack.c.bf16 %v210_v59, %v178_v58  ;;  %v2004_v4 = vpack.c.bf16 %v212_v61, %v180_v60  ;;  %v248_v58 = vld [vmem:[#allocation7 + $0x2d8] sm:$0xff] }
 0x13a   :  { %v1954_v15 = vpack.c.bf16 %v395_v9, %v363_v7  ;;  %v242_v7 = vld [vmem:[#allocation7 + $0x2a8] sm:$0xff]  ;;  %v280_v59 = vld [vmem:[#allocation7 + $0x3d8] sm:$0xff] }
 0x13b   :  { %1903 = vmatpush1.bf16.msra.mxu1 %v1902_v16  ;;  %1919 = vmatpush1.bf16.msra.mxu0 %v1918_v17  ;;  %v173_v16 = vld [vmem:[#allocation7 + $0x80] sm:$0xff]  ;;  %v274_v9 = vld [vmem:[#allocation7 + $0x3a8] sm:$0xff] }
 0x13c   :  { %1905 = vmatprep.subr.bf16.mxu1 %v1904_v20  ;;  %1921 = vmatprep.subr.bf16.mxu0 %v1920_v21  ;;  %v205_v17 = vld [vmem:[#allocation7 + $0x180] sm:$0xff]  ;;  %v175_v20 = vld [vmem:[#allocation7 + $0x90] sm:$0xff] }
 0x13d   :  { %v207_v21 = vld [vmem:[#allocation7 + $0x190] sm:$0xff]  ;;  %v1958_v26 = vpack.c.bf16 %v205_v17, %v173_v16  ;;  %v1992_v16 = vpack.c.bf16 %v274_v9, %v242_v7  ;;  %v2008_v17 = vpack.c.bf16 %v276_v11, %v244_v10  ;;  %v312_v7 = vld [vmem:[#allocation7 + $0x4d8] sm:$0xff] }
 0x13e   :  { %v1974_v27 = vpack.c.bf16 %v207_v21, %v175_v20  ;;  %v306_v20 = vld [vmem:[#allocation7 + $0x4a8] sm:$0xff]  ;;  %v344_v9 = vld [vmem:[#allocation7 + $0x5d8] sm:$0xff] }
 0x13f   :  { %1907 = vmatpush1.bf16.msra.mxu1 %v1906_v28  ;;  %1923 = vmatpush1.bf16.msra.mxu0 %v1922_v29  ;;  %v237_v28 = vld [vmem:[#allocation7 + $0x280] sm:$0xff]  ;;  %v338_v21 = vld [vmem:[#allocation7 + $0x5a8] sm:$0xff] }
 0x140   :  { %1925 = vmatprep.subr.bf16.mxu1 %v1924_v32  ;;  %1941 = vmatprep.subr.bf16.mxu0 %v1940_v33  ;;  %v269_v29 = vld [vmem:[#allocation7 + $0x380] sm:$0xff]  ;;  %v239_v32 = vld [vmem:[#allocation7 + $0x290] sm:$0xff] }
 0x141   :  { %v271_v33 = vld [vmem:[#allocation7 + $0x390] sm:$0xff]  ;;  %v1962_v38 = vpack.c.bf16 %v269_v29, %v237_v28  ;;  %v1996_v28 = vpack.c.bf16 %v338_v21, %v306_v20  ;;  %v2012_v29 = vpack.c.bf16 %v340_v23, %v308_v22  ;;  %v376_v20 = vld [vmem:[#allocation7 + $0x6d8] sm:$0xff] }
 0x142   :  { %1809 = vmatmul.mubr.msk.f32.vlgmr.msra.gmra.mrb[4].mxu1 %vm581_vm3, %v2305_v8  ;;  %1810 = vmatmul.mubr.msk.f32.vlgmr.msra.gmra.mrb[6].mxu0 %vm581_vm3, %v2305_v8  ;;  %v1978_v39 = vpack.c.bf16 %v271_v33, %v239_v32  ;;  %v370_v32 = vld [vmem:[#allocation7 + $0x6a8] sm:$0xff]  ;;  %v408_v21 = vld [vmem:[#allocation7 + $0x7d8] sm:$0xff] }
 0x143   :  { %1927 = vmatpush1.bf16.msra.mxu1 %v1926_v40  ;;  %1943 = vmatpush1.bf16.msra.mxu0 %v1942_v41  ;;  %v301_v40 = vld [vmem:[#allocation7 + $0x480] sm:$0xff]  ;;  %v402_v33 = vld [vmem:[#allocation7 + $0x7a8] sm:$0xff] }
 0x144   :  { %1929 = vmatprep.subr.bf16.mxu1 %v1928_v44  ;;  %1945 = vmatprep.subr.bf16.mxu0 %v1944_v45  ;;  %v333_v41 = vld [vmem:[#allocation7 + $0x580] sm:$0xff]  ;;  %v303_v44 = vld [vmem:[#allocation7 + $0x490] sm:$0xff] }
 0x145   :  { %1075 = vmatprep.mubr.f32.mxu1 %v2217_v0  ;;  %1146 = vmatprep.mubr.f32.mxu0 %v2217_v0  ;;  %v335_v45 = vld [vmem:[#allocation7 + $0x590] sm:$0xff]  ;;  %v1966_v50 = vpack.c.bf16 %v333_v41, %v301_v40  ;;  %v2000_v40 = vpack.c.bf16 %v402_v33, %v370_v32  ;;  %v2016_v41 = vpack.c.bf16 %v404_v35, %v372_v34  ;;  %v188_v32 = vld [vmem:[#allocation7 + $0xf8] sm:$0xff] }
 0x146   :  { %v1982_v51 = vpack.c.bf16 %v335_v45, %v303_v44  ;;  %v182_v44 = vld [vmem:[#allocation7 + $0xc8] sm:$0xff]  ;;  %v220_v33 = vld [vmem:[#allocation7 + $0x1f8] sm:$0xff] }
 0x147   :  { %1931 = vmatpush1.bf16.msra.mxu1 %v1930_v52  ;;  %1947 = vmatpush1.bf16.msra.mxu0 %v1946_v53  ;;  %v365_v52 = vld [vmem:[#allocation7 + $0x680] sm:$0xff]  ;;  %v214_v45 = vld [vmem:[#allocation7 + $0x1c8] sm:$0xff] }
 0x148   :  { %1933 = vmatprep.subr.bf16.mxu1 %v1932_v56  ;;  %1949 = vmatprep.subr.bf16.mxu0 %v1948_v57  ;;  %v397_v53 = vld [vmem:[#allocation7 + $0x780] sm:$0xff]  ;;  %v367_v56 = vld [vmem:[#allocation7 + $0x690] sm:$0xff] }
 0x149   :  { %v399_v57 = vld [vmem:[#allocation7 + $0x790] sm:$0xff]  ;;  %v1970_v62 = vpack.c.bf16 %v397_v53, %v365_v52  ;;  %v2020_v52 = vpack.c.bf16 %v214_v45, %v182_v44  ;;  %v2036_v53 = vpack.c.bf16 %v216_v47, %v184_v46  ;;  %v252_v44 = vld [vmem:[#allocation7 + $0x2f8] sm:$0xff] }
 0x14a   :  { %v1986_v63 = vpack.c.bf16 %v399_v57, %v367_v56  ;;  %v246_v56 = vld [vmem:[#allocation7 + $0x2c8] sm:$0xff]  ;;  %v284_v45 = vld [vmem:[#allocation7 + $0x3f8] sm:$0xff] }
 0x14b   :  { %1935 = vmatpush1.bf16.msra.mxu1 %v1934_v1  ;;  %1951 = vmatpush1.bf16.msra.mxu0 %v1950_v2  ;;  %v177_v1 = vld [vmem:[#allocation7 + $0xa0] sm:$0xff]  ;;  %v278_v57 = vld [vmem:[#allocation7 + $0x3c8] sm:$0xff] }
 0x14c   :  { %1937 = vmatprep.subr.bf16.mxu1 %v1936_v5  ;;  %1953 = vmatprep.subr.bf16.mxu0 %v1952_v6  ;;  %v209_v2 = vld [vmem:[#allocation7 + $0x1a0] sm:$0xff]  ;;  %v179_v5 = vld [vmem:[#allocation7 + $0xb0] sm:$0xff] }
 0x14d   :  { %v211_v6 = vld [vmem:[#allocation7 + $0x1b0] sm:$0xff]  ;;  %v1990_v12 = vpack.c.bf16 %v209_v2, %v177_v1  ;;  %v2024_v1 = vpack.c.bf16 %v278_v57, %v246_v56  ;;  %v2040_v2 = vpack.c.bf16 %v280_v59, %v248_v58  ;;  %v316_v56 = vld [vmem:[#allocation7 + $0x4f8] sm:$0xff] }
 0x14e   :  { %v2006_v13 = vpack.c.bf16 %v211_v6, %v179_v5  ;;  %v310_v5 = vld [vmem:[#allocation7 + $0x4c8] sm:$0xff]  ;;  %v348_v57 = vld [vmem:[#allocation7 + $0x5f8] sm:$0xff] }
 0x14f   :  { %1939 = vmatpush1.bf16.msra.mxu1 %v1938_v14  ;;  %1955 = vmatpush1.bf16.msra.mxu0 %v1954_v15  ;;  %v241_v14 = vld [vmem:[#allocation7 + $0x2a0] sm:$0xff]  ;;  %v342_v6 = vld [vmem:[#allocation7 + $0x5c8] sm:$0xff] }
 0x150   :  { %1957 = vmatprep.subr.bf16.mxu1 %v1956_v18  ;;  %1973 = vmatprep.subr.bf16.mxu0 %v1972_v19  ;;  %v273_v15 = vld [vmem:[#allocation7 + $0x3a0] sm:$0xff]  ;;  %v243_v18 = vld [vmem:[#allocation7 + $0x2b0] sm:$0xff] }
 0x151   :  { %v275_v19 = vld [vmem:[#allocation7 + $0x3b0] sm:$0xff]  ;;  %v1994_v24 = vpack.c.bf16 %v273_v15, %v241_v14  ;;  %v2028_v14 = vpack.c.bf16 %v342_v6, %v310_v5  ;;  %v2044_v15 = vpack.c.bf16 %v344_v9, %v312_v7  ;;  %v380_v5 = vld [vmem:[#allocation7 + $0x6f8] sm:$0xff] }
 0x152   :  { %1811 = vmatmul.mubr.msk.f32.vlgmr.msra.gmra.mrb[6].mxu1 %vm581_vm3, %v2305_v8  ;;  %1812 = vmatmul.mubr.msk.f32.vlgmr.msra.gmra.mrb[8].mxu0 %vm581_vm3, %v2305_v8  ;;  %v2010_v25 = vpack.c.bf16 %v275_v19, %v243_v18  ;;  %v374_v18 = vld [vmem:[#allocation7 + $0x6c8] sm:$0xff]  ;;  %v412_v6 = vld [vmem:[#allocation7 + $0x7f8] sm:$0xff] }
 0x153   :  { %1959 = vmatpush1.bf16.msra.mxu1 %v1958_v26  ;;  %1975 = vmatpush1.bf16.msra.mxu0 %v1974_v27  ;;  %v305_v26 = vld [vmem:[#allocation7 + $0x4a0] sm:$0xff]  ;;  %v406_v19 = vld [vmem:[#allocation7 + $0x7c8] sm:$0xff] }
 0x154   :  { %1961 = vmatprep.subr.bf16.mxu1 %v1960_v30  ;;  %1977 = vmatprep.subr.bf16.mxu0 %v1976_v31  ;;  %v337_v27 = vld [vmem:[#allocation7 + $0x5a0] sm:$0xff]  ;;  %v307_v30 = vld [vmem:[#allocation7 + $0x4b0] sm:$0xff] }
 0x155   :  { %1217 = vmatprep.mubr.f32.mxu1 %v2217_v0  ;;  %1288 = vmatprep.mubr.f32.mxu0 %v2217_v0  ;;  %v339_v31 = vld [vmem:[#allocation7 + $0x5b0] sm:$0xff]  ;;  %v1998_v36 = vpack.c.bf16 %v337_v27, %v305_v26  ;;  %v2032_v26 = vpack.c.bf16 %v406_v19, %v374_v18  ;;  %v2048_v27 = vpack.c.bf16 %v408_v21, %v376_v20  ;;  %v413_v21 = vld [vmem:[#allocation8] sm:$0xff] }
 0x156   :  { %v2014_v37 = vpack.c.bf16 %v339_v31, %v307_v30  ;;  %v186_v30 = vld [vmem:[#allocation7 + $0xe8] sm:$0xff] }
 0x157   :  { %1963 = vmatpush1.bf16.msra.mxu1 %v1962_v38  ;;  %1979 = vmatpush1.bf16.msra.mxu0 %v1978_v39  ;;  %v369_v38 = vld [vmem:[#allocation7 + $0x6a0] sm:$0xff]  ;;  %v218_v31 = vld [vmem:[#allocation7 + $0x1e8] sm:$0xff] }
 0x158   :  { %1965 = vmatprep.subr.bf16.mxu1 %v1964_v42  ;;  %1981 = vmatprep.subr.bf16.mxu0 %v1980_v43  ;;  %v401_v39 = vld [vmem:[#allocation7 + $0x7a0] sm:$0xff]  ;;  %v371_v42 = vld [vmem:[#allocation7 + $0x6b0] sm:$0xff] }
 0x159   :  { %v403_v43 = vld [vmem:[#allocation7 + $0x7b0] sm:$0xff]  ;;  %v2002_v48 = vpack.c.bf16 %v401_v39, %v369_v38  ;;  %v2052_v38 = vpack.c.bf16 %v218_v31, %v186_v30  ;;  %v2068_v39 = vpack.c.bf16 %v220_v33, %v188_v32 }
 0x15a   :  { %v2018_v49 = vpack.c.bf16 %v403_v43, %v371_v42  ;;  %v250_v42 = vld [vmem:[#allocation7 + $0x2e8] sm:$0xff] }
 0x15b   :  { %1967 = vmatpush1.bf16.msra.mxu1 %v1966_v50  ;;  %1983 = vmatpush1.bf16.msra.mxu0 %v1982_v51  ;;  %v181_v50 = vld [vmem:[#allocation7 + $0xc0] sm:$0xff]  ;;  %v282_v43 = vld [vmem:[#allocation7 + $0x3e8] sm:$0xff] }
 0x15c   :  { %1969 = vmatprep.subr.bf16.mxu1 %v1968_v54  ;;  %1985 = vmatprep.subr.bf16.mxu0 %v1984_v55  ;;  %v213_v51 = vld [vmem:[#allocation7 + $0x1c0] sm:$0xff]  ;;  %v183_v54 = vld [vmem:[#allocation7 + $0xd0] sm:$0xff] }
 0x15d   :  { %v215_v55 = vld [vmem:[#allocation7 + $0x1d0] sm:$0xff]  ;;  %v2022_v60 = vpack.c.bf16 %v213_v51, %v181_v50  ;;  %v2056_v50 = vpack.c.bf16 %v282_v43, %v250_v42  ;;  %v2072_v51 = vpack.c.bf16 %v284_v45, %v252_v44 }
 0x15e   :  { %v2038_v61 = vpack.c.bf16 %v215_v55, %v183_v54  ;;  %v314_v54 = vld [vmem:[#allocation7 + $0x4e8] sm:$0xff] }
 0x15f   :  { %1971 = vmatpush1.bf16.msra.mxu1 %v1970_v62  ;;  %1987 = vmatpush1.bf16.msra.mxu0 %v1986_v63  ;;  %v245_v62 = vld [vmem:[#allocation7 + $0x2c0] sm:$0xff]  ;;  %v346_v55 = vld [vmem:[#allocation7 + $0x5e8] sm:$0xff] }
 0x160   :  { %1989 = vmatprep.subr.bf16.mxu1 %v1988_v3  ;;  %2005 = vmatprep.subr.bf16.mxu0 %v2004_v4  ;;  %v277_v63 = vld [vmem:[#allocation7 + $0x3c0] sm:$0xff]  ;;  %v247_v3 = vld [vmem:[#allocation7 + $0x2d0] sm:$0xff] }
 0x161   :  { %v279_v4 = vld [vmem:[#allocation7 + $0x3d0] sm:$0xff]  ;;  %v2026_v10 = vpack.c.bf16 %v277_v63, %v245_v62  ;;  %v2060_v62 = vpack.c.bf16 %v346_v55, %v314_v54  ;;  %v2076_v63 = vpack.c.bf16 %v348_v57, %v316_v56 }
 0x162   :  { %1813 = vmatmul.mubr.msk.f32.vlgmr.msra.gmra.mrb[8].mxu1 %vm581_vm3, %v2305_v8  ;;  %1814 = vmatmul.mubr.msk.f32.vlgmr.msra.gmra.mrb[10].mxu0 %vm581_vm3, %v2305_v8  ;;  %v2042_v11 = vpack.c.bf16 %v279_v4, %v247_v3  ;;  %v378_v3 = vld [vmem:[#allocation7 + $0x6e8] sm:$0xff] }
 0x163   :  { %1991 = vmatpush1.bf16.msra.mxu1 %v1990_v12  ;;  %2007 = vmatpush1.bf16.msra.mxu0 %v2006_v13  ;;  %v309_v12 = vld [vmem:[#allocation7 + $0x4c0] sm:$0xff]  ;;  %v410_v4 = vld [vmem:[#allocation7 + $0x7e8] sm:$0xff] }
 0x164   :  { %1993 = vmatprep.subr.bf16.mxu1 %v1992_v16  ;;  %2009 = vmatprep.subr.bf16.mxu0 %v2008_v17  ;;  %v341_v13 = vld [vmem:[#allocation7 + $0x5c0] sm:$0xff]  ;;  %v311_v16 = vld [vmem:[#allocation7 + $0x4d0] sm:$0xff] }
 0x165   :  { %1359 = vmatprep.mubr.f32.mxu1 %v2217_v0  ;;  %1430 = vmatprep.mubr.f32.mxu0 %v2217_v0  ;;  %v343_v17 = vld [vmem:[#allocation7 + $0x5d0] sm:$0xff]  ;;  %v2030_v22 = vpack.c.bf16 %v341_v13, %v309_v12  ;;  %v2080_v12 = vpack.c.bf16 %v412_v6, %v380_v5  ;;  %v409_v13 = vld [vmem:[#allocation7 + $0x7e0] sm:$0xff] }
 0x166   :  { %v2046_v23 = vpack.c.bf16 %v343_v17, %v311_v16 }
 0x167   :  { %1995 = vmatpush1.bf16.msra.mxu1 %v1994_v24  ;;  %2011 = vmatpush1.bf16.msra.mxu0 %v2010_v25  ;;  %v373_v24 = vld [vmem:[#allocation7 + $0x6c0] sm:$0xff] }
 0x168   :  { %1997 = vmatprep.subr.bf16.mxu1 %v1996_v28  ;;  %2013 = vmatprep.subr.bf16.mxu0 %v2012_v29  ;;  %v405_v25 = vld [vmem:[#allocation7 + $0x7c0] sm:$0xff]  ;;  %v375_v28 = vld [vmem:[#allocation7 + $0x6d0] sm:$0xff] }
 0x169   :  { %v407_v29 = vld [vmem:[#allocation7 + $0x7d0] sm:$0xff]  ;;  %v2034_v34 = vpack.c.bf16 %v405_v25, %v373_v24 }
 0x16a   :  { %v2050_v35 = vpack.c.bf16 %v407_v29, %v375_v28 }
 0x16b   :  { %1999 = vmatpush1.bf16.msra.mxu1 %v1998_v36  ;;  %2015 = vmatpush1.bf16.msra.mxu0 %v2014_v37  ;;  %v185_v36 = vld [vmem:[#allocation7 + $0xe0] sm:$0xff] }
 0x16c   :  { %2001 = vmatprep.subr.bf16.mxu1 %v2000_v40  ;;  %2017 = vmatprep.subr.bf16.mxu0 %v2016_v41  ;;  %v217_v37 = vld [vmem:[#allocation7 + $0x1e0] sm:$0xff]  ;;  %v187_v40 = vld [vmem:[#allocation7 + $0xf0] sm:$0xff] }
 0x16d   :  { %v219_v41 = vld [vmem:[#allocation7 + $0x1f0] sm:$0xff]  ;;  %v2054_v46 = vpack.c.bf16 %v217_v37, %v185_v36 }
 0x16e   :  { %v2070_v47 = vpack.c.bf16 %v219_v41, %v187_v40 }
 0x16f   :  { %2003 = vmatpush1.bf16.msra.mxu1 %v2002_v48  ;;  %2019 = vmatpush1.bf16.msra.mxu0 %v2018_v49  ;;  %v249_v48 = vld [vmem:[#allocation7 + $0x2e0] sm:$0xff] }
 0x170   :  { %2021 = vmatprep.subr.bf16.mxu1 %v2020_v52  ;;  %2037 = vmatprep.subr.bf16.mxu0 %v2036_v53  ;;  %v281_v49 = vld [vmem:[#allocation7 + $0x3e0] sm:$0xff]  ;;  %v251_v52 = vld [vmem:[#allocation7 + $0x2f0] sm:$0xff] }
 0x171   :  { %v283_v53 = vld [vmem:[#allocation7 + $0x3f0] sm:$0xff]  ;;  %v2058_v58 = vpack.c.bf16 %v281_v49, %v249_v48 }
 0x172   :  { %1815 = vmatmul.mubr.msk.f32.vlgmr.msra.gmra.mrb[10].mxu1 %vm581_vm3, %v2305_v8  ;;  %1816 = vmatmul.mubr.msk.f32.vlgmr.msra.gmra.mrb[12].mxu0 %vm581_vm3, %v2305_v8  ;;  %v2074_v59 = vpack.c.bf16 %v283_v53, %v251_v52 }
 0x173   :  { %2023 = vmatpush1.bf16.msra.mxu1 %v2022_v60  ;;  %2039 = vmatpush1.bf16.msra.mxu0 %v2038_v61  ;;  %v313_v60 = vld [vmem:[#allocation7 + $0x4e0] sm:$0xff] }
 0x174   :  { %2025 = vmatprep.subr.bf16.mxu1 %v2024_v1  ;;  %2041 = vmatprep.subr.bf16.mxu0 %v2040_v2  ;;  %v345_v61 = vld [vmem:[#allocation7 + $0x5e0] sm:$0xff]  ;;  %v315_v1 = vld [vmem:[#allocation7 + $0x4f0] sm:$0xff] }
 0x175   :  { %1501 = vmatprep.mubr.f32.mxu1 %v2217_v0  ;;  %1572 = vmatprep.mubr.f32.mxu0 %v2217_v0  ;;  %v347_v2 = vld [vmem:[#allocation7 + $0x5f0] sm:$0xff]  ;;  %v2062_v7 = vpack.c.bf16 %v345_v61, %v313_v60 }
 0x176   :  { %v2078_v9 = vpack.c.bf16 %v347_v2, %v315_v1 }
 0x177   :  { %2027 = vmatpush1.bf16.msra.mxu1 %v2026_v10  ;;  %2043 = vmatpush1.bf16.msra.mxu0 %v2042_v11  ;;  %v377_v10 = vld [vmem:[#allocation7 + $0x6e0] sm:$0xff]  ;;  %v2064_v11 = vpack.c.bf16 %v410_v4, %v378_v3 }
 0x178   :  { %2029 = vmatprep.subr.bf16.mxu1 %v2028_v14  ;;  %2045 = vmatprep.subr.bf16.mxu0 %v2044_v15  ;;  %v379_v14 = vld [vmem:[#allocation7 + $0x6f0] sm:$0xff]  ;;  %v2066_v16 = vpack.c.bf16 %v409_v13, %v377_v10 }
 0x179   :  { %v411_v15 = vld [vmem:[#allocation7 + $0x7f0] sm:$0xff] }
 0x17a   :  { %v2082_v17 = vpack.c.bf16 %v411_v15, %v379_v14 }
 0x17b   :  { %2031 = vmatpush1.bf16.msra.mxu1 %v2030_v22  ;;  %2047 = vmatpush1.bf16.msra.mxu0 %v2046_v23 }
 0x17c   :  { %2033 = vmatprep.subr.bf16.mxu1 %v2032_v26  ;;  %2049 = vmatprep.subr.bf16.mxu0 %v2048_v27 }
 0x17f   :  { %2035 = vmatpush1.bf16.msra.mxu1 %v2034_v34  ;;  %2051 = vmatpush1.bf16.msra.mxu0 %v2050_v35 }
 0x180   :  { %2053 = vmatprep.subr.bf16.mxu1 %v2052_v38  ;;  %2069 = vmatprep.subr.bf16.mxu0 %v2068_v39 }
 0x182   :  { %1817 = vmatmul.mubr.msk.f32.vlgmr.msra.gmra.mrb[12].mxu1 %vm581_vm3, %v2305_v8  ;;  %1818 = vmatmul.mubr.msk.f32.vlgmr.msra.gmra.mrb[14].mxu0 %vm581_vm3, %v2305_v8 }
 0x183   :  { %2055 = vmatpush1.bf16.msra.mxu1 %v2054_v46  ;;  %2071 = vmatpush1.bf16.msra.mxu0 %v2070_v47 }
 0x184   :  { %2057 = vmatprep.subr.bf16.mxu1 %v2056_v50  ;;  %2073 = vmatprep.subr.bf16.mxu0 %v2072_v51 }
 0x185   :  { %1643 = vmatprep.mubr.f32.mxu1 %v2217_v0  ;;  %1714 = vmatprep.mubr.f32.mxu0 %v2217_v0  ;;  %v421_v0 = vlaneseq }
 0x187   :  { %2059 = vmatpush1.bf16.msra.mxu1 %v2058_v58  ;;  %2075 = vmatpush1.bf16.msra.mxu0 %v2074_v59  ;;  %v422_v18 = vshrl.u32 %v421_v0, 7  ;;  %v414_v59 = vld [vmem:[#allocation8 + $0x8] sm:$0xff] }
 0x188   :  { %2061 = vmatprep.subr.bf16.mxu1 %v2060_v62  ;;  %2077 = vmatprep.subr.bf16.mxu0 %v2076_v63 }
 0x189   :  { %v2353_v19 = vsub.s32 0, %v422_v18  ;;  %v2355_v20 = vsub.s32 2, %v422_v18  ;;  %v2357_v22 = vsub.s32 1, %v422_v18  ;;  %v2359_v23 = vsub.s32 3, %v422_v18 }
 0x18a   :  { %v2365_v39 = vsub.s32 4, %v422_v18  ;;  %v2367_v40 = vsub.s32 6, %v422_v18  ;;  %v2369_v41 = vsub.s32 5, %v422_v18  ;;  %v2371_v42 = vsub.s32 7, %v422_v18 }
 0x18b   :  { %2063 = vmatpush1.bf16.msra.mxu1 %v2062_v7  ;;  %2079 = vmatpush1.bf16.msra.mxu0 %v2078_v9  ;;  %v424_v24 = vrot.slane %v413_v21, %v2353_v19  ;;  %v432_v25 = vrot.slane %v413_v21, %v2355_v20  ;;  %v428_v26 = vrot.slane %v413_v21, %v2357_v22 }
 0x18c   :  { %2065 = vmatprep.subr.bf16.mxu1 %v2064_v11  ;;  %2081 = vmatprep.subr.bf16.mxu0 %v2080_v12  ;;  %v436_v27 = vrot.slane %v413_v21, %v2359_v23  ;;  %v440_v43 = vrot.slane %v413_v21, %v2365_v39  ;;  %v448_v44 = vrot.slane %v413_v21, %v2367_v40 }
 0x18d   :  { %v444_v45 = vrot.slane %v413_v21, %v2369_v41  ;;  %v452_v46 = vrot.slane %v413_v21, %v2371_v42  ;;  %v456_v60 = vrot.slane %v414_v59, %v2353_v19  ;;  %v464_v61 = vrot.slane %v414_v59, %v2355_v20 }
 0x18e   :  { %v460_v62 = vrot.slane %v414_v59, %v2357_v22  ;;  %v468_v63 = vrot.slane %v414_v59, %v2359_v23  ;;  %v472_v14 = vrot.slane %v414_v59, %v2365_v39  ;;  %v480_v15 = vrot.slane %v414_v59, %v2367_v40 }
 0x18f   :  { %2067 = vmatpush1.bf16.msra.mxu1 %v2066_v16  ;;  %2083 = vmatpush1.bf16.msra.mxu0 %v2082_v17  ;;  %v476_v16 = vrot.slane %v414_v59, %v2369_v41  ;;  %v484_v17 = vrot.slane %v414_v59, %v2371_v42 }
 0x192   :  { %1819 = vmatmul.mubr.msk.f32.vlgmr.msra.gmra.mrb[14].mxu1 %vm581_vm3, %v2305_v8  ;;  %1820 = vmatmul.mubr.msk.f32.vlgmr.msra.gmra.mrb[16].mxu0 %vm581_vm3, %v2305_v8 }
 0x1f5   :  { %v651_v8 = vpop.f32.mrb[0].mxu1  ;;  %v722_v28 = vpop.f32.mrb[2].mxu0 }
 0x1f6   :  { %v652_v29 = vadd.f32 %v651_v8, %v424_v24  ;;  %v723_v30 = vadd.f32 %v722_v28, %v432_v25  ;;  %v653_v31 = vpop.f32.mrb[1].mxu1  ;;  %v724_v32 = vpop.f32.mrb[3].mxu0 }
 0x1f7   :  { %v654_v33 = vadd.f32 %v653_v31, %v428_v26  ;;  %v725_v34 = vadd.f32 %v724_v32, %v436_v27  ;;  %v415_v32 = vld [vmem:[#allocation8 + $0x10] sm:$0xff] }
 0x1f8   :  { %v1721_v35 = vmax.f32 %v652_v29, 0.0  ;;  %v1723_v36 = vmax.f32 %v723_v30, 0.0 }
 0x1f9   :  { %v1722_v37 = vmax.f32 %v654_v33, 0.0  ;;  %v1724_v38 = vmax.f32 %v725_v34, 0.0  ;;  %v488_v33 = vrot.slane %v415_v32, %v2353_v19  ;;  %v496_v34 = vrot.slane %v415_v32, %v2355_v20 }
 0x1fa   :  { %1753 = vst [vmem:[#allocation10] sm:$0xff] %v1721_v35  ;;  %1755 = vst [vmem:[#allocation10 + $0x10] sm:$0xff] %v1723_v36  ;;  %v492_v35 = vrot.slane %v415_v32, %v2357_v22  ;;  %v500_v36 = vrot.slane %v415_v32, %v2359_v23 }
 0x1fb   :  { %1754 = vst [vmem:[#allocation10 + $0x8] sm:$0xff] %v1722_v37  ;;  %1756 = vst [vmem:[#allocation10 + $0x18] sm:$0xff] %v1724_v38 }
 0x205   :  { %v793_v47 = vpop.f32.mrb[2].mxu1  ;;  %v864_v48 = vpop.f32.mrb[4].mxu0 }
 0x206   :  { %v794_v49 = vadd.f32 %v793_v47, %v440_v43  ;;  %v865_v50 = vadd.f32 %v864_v48, %v448_v44  ;;  %v795_v51 = vpop.f32.mrb[3].mxu1  ;;  %v866_v52 = vpop.f32.mrb[5].mxu0 }
 0x207   :  { %v796_v53 = vadd.f32 %v795_v51, %v444_v45  ;;  %v867_v54 = vadd.f32 %v866_v52, %v452_v46 }
 0x208   :  { %v1725_v55 = vmax.f32 %v794_v49, 0.0  ;;  %v1727_v56 = vmax.f32 %v865_v50, 0.0 }
 0x209   :  { %v1726_v57 = vmax.f32 %v796_v53, 0.0  ;;  %v1728_v58 = vmax.f32 %v867_v54, 0.0  ;;  %v504_v53 = vrot.slane %v415_v32, %v2365_v39  ;;  %v512_v54 = vrot.slane %v415_v32, %v2367_v40 }
 0x20a   :  { %1757 = vst [vmem:[#allocation10 + $0x20] sm:$0xff] %v1725_v55  ;;  %1759 = vst [vmem:[#allocation10 + $0x30] sm:$0xff] %v1727_v56  ;;  %v508_v55 = vrot.slane %v415_v32, %v2369_v41  ;;  %v516_v56 = vrot.slane %v415_v32, %v2371_v42 }
 0x20b   :  { %1758 = vst [vmem:[#allocation10 + $0x28] sm:$0xff] %v1726_v57  ;;  %1760 = vst [vmem:[#allocation10 + $0x38] sm:$0xff] %v1728_v58 }
 0x215   :  { %v935_v1 = vpop.f32.mrb[4].mxu1  ;;  %v1006_v2 = vpop.f32.mrb[6].mxu0 }
 0x216   :  { %v936_v3 = vadd.f32 %v935_v1, %v456_v60  ;;  %v1007_v4 = vadd.f32 %v1006_v2, %v464_v61  ;;  %v937_v5 = vpop.f32.mrb[5].mxu1  ;;  %v1008_v6 = vpop.f32.mrb[7].mxu0 }
 0x217   :  { %v938_v7 = vadd.f32 %v937_v5, %v460_v62  ;;  %v1009_v9 = vadd.f32 %v1008_v6, %v468_v63  ;;  %v416_v6 = vld [vmem:[#allocation8 + $0x18] sm:$0xff] }
 0x218   :  { %v1729_v10 = vmax.f32 %v936_v3, 0.0  ;;  %v1731_v11 = vmax.f32 %v1007_v4, 0.0 }
 0x219   :  { %v1730_v12 = vmax.f32 %v938_v7, 0.0  ;;  %v1732_v13 = vmax.f32 %v1009_v9, 0.0  ;;  %v520_v7 = vrot.slane %v416_v6, %v2353_v19  ;;  %v528_v9 = vrot.slane %v416_v6, %v2355_v20 }
 0x21a   :  { %1761 = vst [vmem:[#allocation10 + $0x40] sm:$0xff] %v1729_v10  ;;  %1763 = vst [vmem:[#allocation10 + $0x50] sm:$0xff] %v1731_v11  ;;  %v524_v10 = vrot.slane %v416_v6, %v2357_v22  ;;  %v532_v11 = vrot.slane %v416_v6, %v2359_v23  ;;  %v536_v19 = vrot.slane %v416_v6, %v2365_v39 }
 0x21b   :  { %1762 = vst [vmem:[#allocation10 + $0x48] sm:$0xff] %v1730_v12  ;;  %1764 = vst [vmem:[#allocation10 + $0x58] sm:$0xff] %v1732_v13  ;;  %v544_v20 = vrot.slane %v416_v6, %v2367_v40  ;;  %v540_v22 = vrot.slane %v416_v6, %v2369_v41  ;;  %v548_v23 = vrot.slane %v416_v6, %v2371_v42 }
 0x225   :  { %v1077_v0 = vpop.f32.mrb[6].mxu1  ;;  %v1148_v18 = vpop.f32.mrb[8].mxu0 }
 0x226   :  { %v1078_v21 = vadd.f32 %v1077_v0, %v472_v14  ;;  %v1149_v24 = vadd.f32 %v1148_v18, %v480_v15  ;;  %v1079_v25 = vpop.f32.mrb[7].mxu1  ;;  %v1150_v26 = vpop.f32.mrb[9].mxu0 }
 0x227   :  { %v1080_v27 = vadd.f32 %v1079_v25, %v476_v16  ;;  %v1151_v8 = vadd.f32 %v1150_v26, %v484_v17 }
 0x228   :  { %v1733_v28 = vmax.f32 %v1078_v21, 0.0  ;;  %v1735_v29 = vmax.f32 %v1149_v24, 0.0 }
 0x229   :  { %v1734_v30 = vmax.f32 %v1080_v27, 0.0  ;;  %v1736_v31 = vmax.f32 %v1151_v8, 0.0 }
 0x22a   :  { %1765 = vst [vmem:[#allocation10 + $0x60] sm:$0xff] %v1733_v28  ;;  %1767 = vst [vmem:[#allocation10 + $0x70] sm:$0xff] %v1735_v29 }
 0x22b   :  { %1766 = vst [vmem:[#allocation10 + $0x68] sm:$0xff] %v1734_v30  ;;  %1768 = vst [vmem:[#allocation10 + $0x78] sm:$0xff] %v1736_v31 }
 0x235   :  { %v1219_v37 = vpop.f32.mrb[8].mxu1  ;;  %v1290_v38 = vpop.f32.mrb[10].mxu0 }
 0x236   :  { %v1220_v43 = vadd.f32 %v1219_v37, %v488_v33  ;;  %v1291_v44 = vadd.f32 %v1290_v38, %v496_v34  ;;  %v1221_v45 = vpop.f32.mrb[9].mxu1  ;;  %v1292_v46 = vpop.f32.mrb[11].mxu0 }
 0x237   :  { %v1222_v47 = vadd.f32 %v1221_v45, %v492_v35  ;;  %v1293_v48 = vadd.f32 %v1292_v46, %v500_v36 }
 0x238   :  { %v1737_v49 = vmax.f32 %v1220_v43, 0.0  ;;  %v1739_v50 = vmax.f32 %v1291_v44, 0.0 }
 0x239   :  { %v1738_v51 = vmax.f32 %v1222_v47, 0.0  ;;  %v1740_v52 = vmax.f32 %v1293_v48, 0.0 }
 0x23a   :  { %1769 = vst [vmem:[#allocation10 + $0x80] sm:$0xff] %v1737_v49  ;;  %1771 = vst [vmem:[#allocation10 + $0x90] sm:$0xff] %v1739_v50 }
 0x23b   :  { %1770 = vst [vmem:[#allocation10 + $0x88] sm:$0xff] %v1738_v51  ;;  %1772 = vst [vmem:[#allocation10 + $0x98] sm:$0xff] %v1740_v52 }
 0x245   :  { %v1361_v57 = vpop.f32.mrb[10].mxu1  ;;  %v1432_v58 = vpop.f32.mrb[12].mxu0 }
 0x246   :  { %v1362_v59 = vadd.f32 %v1361_v57, %v504_v53  ;;  %v1433_v60 = vadd.f32 %v1432_v58, %v512_v54  ;;  %v1363_v61 = vpop.f32.mrb[11].mxu1  ;;  %v1434_v62 = vpop.f32.mrb[13].mxu0 }
 0x247   :  { %v1364_v63 = vadd.f32 %v1363_v61, %v508_v55  ;;  %v1435_v1 = vadd.f32 %v1434_v62, %v516_v56 }
 0x248   :  { %v1741_v2 = vmax.f32 %v1362_v59, 0.0  ;;  %v1743_v3 = vmax.f32 %v1433_v60, 0.0 }
 0x249   :  { %v1742_v4 = vmax.f32 %v1364_v63, 0.0  ;;  %v1744_v5 = vmax.f32 %v1435_v1, 0.0 }
 0x24a   :  { %1773 = vst [vmem:[#allocation10 + $0xa0] sm:$0xff] %v1741_v2  ;;  %1775 = vst [vmem:[#allocation10 + $0xb0] sm:$0xff] %v1743_v3 }
 0x24b   :  { %1774 = vst [vmem:[#allocation10 + $0xa8] sm:$0xff] %v1742_v4  ;;  %1776 = vst [vmem:[#allocation10 + $0xb8] sm:$0xff] %v1744_v5 }
 0x255   :  { %v1503_v12 = vpop.f32.mrb[12].mxu1  ;;  %v1574_v13 = vpop.f32.mrb[14].mxu0 }
 0x256   :  { %v1504_v14 = vadd.f32 %v1503_v12, %v520_v7  ;;  %v1575_v15 = vadd.f32 %v1574_v13, %v528_v9  ;;  %v1505_v16 = vpop.f32.mrb[13].mxu1  ;;  %v1576_v17 = vpop.f32.mrb[15].mxu0 }
 0x257   :  { %v1506_v0 = vadd.f32 %v1505_v16, %v524_v10  ;;  %v1577_v18 = vadd.f32 %v1576_v17, %v532_v11 }
 0x258   :  { %v1745_v21 = vmax.f32 %v1504_v14, 0.0  ;;  %v1747_v24 = vmax.f32 %v1575_v15, 0.0 }
 0x259   :  { %v1746_v25 = vmax.f32 %v1506_v0, 0.0  ;;  %v1748_v26 = vmax.f32 %v1577_v18, 0.0 }
 0x25a   :  { %1777 = vst [vmem:[#allocation10 + $0xc0] sm:$0xff] %v1745_v21  ;;  %1779 = vst [vmem:[#allocation10 + $0xd0] sm:$0xff] %v1747_v24 }
 0x25b   :  { %1778 = vst [vmem:[#allocation10 + $0xc8] sm:$0xff] %v1746_v25  ;;  %1780 = vst [vmem:[#allocation10 + $0xd8] sm:$0xff] %v1748_v26 }
 0x265   :  { %v1645_v27 = vpop.f32.mrb[14].mxu1  ;;  %v1716_v8 = vpop.f32.mrb[16].mxu0 }
 0x266   :  { %v1646_v28 = vadd.f32 %v1645_v27, %v536_v19  ;;  %v1717_v29 = vadd.f32 %v1716_v8, %v544_v20  ;;  %v1647_v30 = vpop.f32.mrb[15].mxu1  ;;  %v1718_v31 = vpop.f32.mrb[17].mxu0 }
 0x267   :  { %v1648_v32 = vadd.f32 %v1647_v30, %v540_v22  ;;  %v1719_v33 = vadd.f32 %v1718_v31, %v548_v23 }
 0x268   :  { %v1749_v34 = vmax.f32 %v1646_v28, 0.0  ;;  %v1751_v35 = vmax.f32 %v1717_v29, 0.0 }
 0x269   :  { %v1750_v36 = vmax.f32 %v1648_v32, 0.0  ;;  %v1752_v39 = vmax.f32 %v1719_v33, 0.0 }
 0x26a   :  { %1781 = vst [vmem:[#allocation10 + $0xe0] sm:$0xff] %v1749_v34  ;;  %1783 = vst [vmem:[#allocation10 + $0xf0] sm:$0xff] %v1751_v35 }
 0x26b   :  { %1782 = vst [vmem:[#allocation10 + $0xe8] sm:$0xff] %v1750_v36  ;;  %1784 = vst [vmem:[#allocation10 + $0xf8] sm:$0xff] %v1752_v39 }
 0x26c   :  { %2192 = shalt.err (!%p2189_p8)
}
 0x26d   :  { %s2193_s19 = scalar_lea.hbm %s2418_s5, 4096 }
 0x26e   :  { %p2194_p9 = scmp.ne.s32.totalorder %s2418_s5, %s2193_s19  ;;  %p2197_p10 = scmp.lt.u32.totalorder %s2193_s19, %s2418_s5 }
 0x270   :  { %p2199_p11 = pnand %p2197_p10, %p2194_p9 }
 0x272   :  { %2202 = shalt.err (!%p2199_p11)
}
 0x273   :  { %1794 = dma.vmem_to_hbm [thread:$0]  %s1792_s15, 4096, %s2418_s5, [#allocation4]  }
 0x274   :  { %2209 = dma.done.wait [#allocation4], 4096  }
 0x275   :  { %2210 = vsyncadd [#allocation4], 4294963200 }
 0x276   :  { %1798 = vsyncpa [#allocation3], 1 }
 0x277   :  { %1799 = vsyncpa [#allocation6], 1 }
 0x278   :  { %1800 = vsyncpa [#allocation9], 1 }
 0x279   :  { %1801 = vsyncpa [#allocation4], 1 }

</bundles_post_ra>
